<compile_context>
chip_gen: v7x
topology: tpu7x:2x2x1
jax: 0.10.0
libtpu: 0.0.40
codegen_flags: <defaults>
</compile_context>

<pallas_src>
import functools

import numpy as np
import jax
import jax.numpy as jnp
from jax.experimental import pallas as pl
from jax.experimental.pallas import tpu as pltpu


def _round_up(x, m):
    return ((x + m - 1) // m) * m


# ----------------------------------------------------------------------------
# Lag selection (glue; data-dependent, mirrors TimeLagLoss._topk_lags + _dedup)
# ----------------------------------------------------------------------------
def _select_lags(label, top_k, total_len):
    """Returns (static tuple of lags, np.float32 weights)."""
    L = label.shape[1]
    # TODO(synk): rfft / top_k lag selection has no Pallas lowering; computed in
    # plain JAX + a host round-trip (the PyTorch module also leaves this path on
    # .cpu().numpy()).  In a training loop, recompute the lags only every N steps
    # and cache them: jax.jit below caches one compiled kernel per lag *set*.
    spec = jnp.abs(jnp.fft.rfft(label.astype(jnp.float32), axis=1)).mean(0).mean(-1)
    d = spec[1:] - spec[:-1]
    _, idx = jax.lax.top_k(d, top_k)
    idx_np = np.asarray(jax.device_get(idx))
    spec_np = np.asarray(jax.device_get(spec))
    lags_np = L // (idx_np + 1)
    vals_np = spec_np[idx_np + 1]
    # dedup: keep first occurrence of each lag (same as PyTorch _dedup)
    seen, keep = set(), []
    for i, p in enumerate(lags_np.tolist()):
        if p not in seen:
            seen.add(p)
            keep.append(i)
    keep = np.asarray(keep, int)
    lags_np, vals_np = lags_np[keep], vals_np[keep]
    # Guard (intentional deviation): a lag >= hist_len + pred_len differences an
    # empty sequence (the PyTorch module would produce NaN there); drop it.
    ok = lags_np < total_len
    lags_np, vals_np = lags_np[ok], vals_np[ok]
    if vals_np.size:
        weights_np = vals_np / vals_np.sum()
    else:
        weights_np = vals_np
    return tuple(int(p) for p in lags_np.tolist()), np.asarray(weights_np, np.float32)


# ----------------------------------------------------------------------------
# Pallas kernel
# ----------------------------------------------------------------------------
def _make_kernel(lags, hist_len, pred_len, n_channels, n_rows, block_rows):
    lags = tuple(int(p) for p in lags)
    H, L, C = int(hist_len), int(pred_len), int(n_channels)
    LC = L * C
    K = len(lags)
    mask_rows = (int(n_rows) % int(block_rows)) != 0

    def _sum11(x):
        # Full reduction kept as a (1, 1) value: lane reduce then sublane reduce
        # (avoids rank-0 scalars inside the kernel).
        return jnp.sum(jnp.sum(x, axis=1, keepdims=True), axis=0, keepdims=True)

    def kernel(coef_ref, sel_ref, pred_ref, label_ref, out_ref, acc_ref):
        # History cancels algebraically: d = pred_full - label_full = [0_H | e],
        # e = pred - label, so only the forecast windows are ever read.  Upcast to
        # f32 per tile (inputs may be bf16).
        e = pred_ref[...].astype(jnp.float32) - label_ref[...].astype(jnp.float32)

        if mask_rows:
            # Last row-block hangs past the true batch: its out-of-range rows hold
            # unspecified data, so select them to exactly 0.
            r0 = pl.program_id(0) * block_rows
            rid = r0 + jax.lax.broadcasted_iota(jnp.int32, e.shape, 0)
            e = jnp.where(rid < n_rows, e, 0.0)

        # Elementwise accumulation of the weighted per-lag |diffs| (VPU only).
        # The destination slice always starts at column 0: since acc is fully
        # summed below, the position of each addend is irrelevant, so no shifted
        # full-width temporaries and no per-lag cross-lane reductions are needed.
        acc_ref[...] = jnp.zeros_like(acc_ref)
        for k, p in enumerate(lags):
            c_k = coef_ref[k]                    # SMEM scalar: w_k / (B*C*(T-p))
            if p == 0:                           # plain L1 (dead for rfft lags)
                acc_ref[...] = acc_ref[...] + jnp.abs(e) * c_k
                continue
            pc = p * C
            a0 = max(p - H, 0) * C
            s1 = min(pc, LC)
            if s1 > a0:
                # Seam with the (cancelled) history: |e[:, j]| for flat j in [a0, s1).
                w = s1 - a0
                acc_ref[:, :w] = acc_ref[:, :w] + jnp.abs(e[:, a0:s1]) * c_k
            if pc < LC:
                # Both endpoints inside the forecast window: |e[j] - e[j - p*C]|.
                w = LC - pc
                acc_ref[:, :w] = acc_ref[:, :w] + jnp.abs(e[:, pc:] - e[:, :w]) * c_k

        part = _sum11(acc_ref[...])              # ONE big reduction per tile

        # Mean-window L1 term: per-(row, channel) time sums on the otherwise-idle
        # MXU via the replicated-identity selector (sel[t*C + c, c'] = [c == c']),
        # then a tiny reduction.  coef_ref[K] = alpha / (B*C*L).
        chan_sum = jnp.dot(e, sel_ref[...], preferred_element_type=jnp.float32)
        part = part + _sum11(jnp.abs(chan_sum)) * coef_ref[K]

        out_ref[0, :, :] = part                  # per-tile partial

    return kernel


def _choose_row_tile(n_rows, lane_cols, in_itemsize):
    """Batch-row tile for (rows, L*C) blocks.  Returns (row_tile, grid)."""
    n_rows = max(int(n_rows), 1)
    lanes_pad = _round_up(max(int(lane_cols), 1), 128)        # real VMEM lane width
    # Per block row: 2 inputs x 2 pipeline buffers (input dtype) + the f32
    # accumulator scratch + ~3 live f32 temporaries in the kernel body.
    per_row = lanes_pad * (2 * 2 * int(in_itemsize) + 4 * 4)
    budget = 20 * 1024 * 1024                                   # under 32 MiB limit
    cap = max(8, (budget // per_row) // 8 * 8)                  # hard VMEM cap (rows)
    if n_rows < 16 and n_rows <= cap:
        return n_rows, 1                                        # single full block
    # ~0.5 MiB per input block floor (per-step overhead / DMA efficiency), but the
    # ">=2 grid steps" rule (v7x megacore + pipelining) takes priority over it.
    floor = max(8, _round_up(-(-(512 * 1024) // (lanes_pad * int(in_itemsize))), 8))
    floor = min(floor, cap)
    tile = min(cap, _round_up(n_rows, 8))
    t4 = _round_up(-(-n_rows // 4), 8)
    t2 = _round_up(-(-n_rows // 2), 8)
    if t4 >= floor:
        tile = min(tile, t4)          # >=4 steps when blocks stay big enough
    else:
        tile = min(tile, t2)          # else at least 2 steps
    tile = max(8, tile)
    grid = -(-n_rows // tile)
    return tile, grid


@functools.partial(jax.jit, static_argnames=("lags", "hist_len", "alpha"))
def _time_lag_loss_call(pred, label, weights, *, lags, hist_len, alpha):
    B, L, C = pred.shape
    H = int(hist_len)
    T = H + L
    R = B * C
    LC = L * C
    K = len(lags)

    # Free layout change: (B, L, C) -> (B, L*C) is a row-major collapse of the two
    # contiguous minor dims — no transpose, no extra HBM traffic.  Input dtype is
    # preserved (bf16 passes straight through; the kernel upcasts per tile).
    pred2 = pred.reshape(B, LC)
    label2 = label.reshape(B, LC)

    itemsize = jnp.dtype(pred2.dtype).itemsize
    row_tile, grid = _choose_row_tile(B, LC, itemsize)

    # SMEM coefficient vector (traced -> weight changes never recompile):
    #   coef[k] = w_k / (B*C*(T - p_k)) ,  coef[K] = alpha / (B*C*L).
    denom = np.asarray([float(R * ((T - p) if p > 0 else T)) for p in lags],
                       np.float32)
    coef = jnp.concatenate([
        jnp.asarray(weights, jnp.float32) / jnp.asarray(denom, jnp.float32),
        jnp.asarray([alpha / (R * L)], jnp.float32),
    ])

    # Replicated-identity selector for the MXU time-sum: sel[t*C + c, c'] = [c==c'].
    sel = jnp.asarray(np.tile(np.eye(C, dtype=np.float32), (L, 1)))

    kernel = _make_kernel(lags, H, L, C, B, row_tile)

    partials = pl.pallas_call(
        kernel,
        out_shape=jax.ShapeDtypeStruct((grid, 1, 1), jnp.float32),
        grid=(grid,),
        in_specs=[
            pl.BlockSpec(memory_space=pltpu.MemorySpace.SMEM),   # coef: K+1 scalars
            pl.BlockSpec((LC, C), lambda g: (0, 0)),             # sel, VMEM-resident
            pl.BlockSpec((row_tile, LC), lambda g: (g, 0)),      # pred row tile
            pl.BlockSpec((row_tile, LC), lambda g: (g, 0)),      # label row tile
        ],
        out_specs=pl.BlockSpec((1, 1, 1), lambda g: (g, 0, 0)),  # per-tile partial
        scratch_shapes=[pltpu.VMEM((row_tile, LC), jnp.float32)],  # lag accumulator
        compiler_params=pltpu.CompilerParams(
            dimension_semantics=("parallel",),                   # independent tiles
            vmem_limit_bytes=32 * 1024 * 1024,
        ),
    )(coef, sel, pred2, label2)

    return jnp.sum(partials)


def time_lag_loss(pred, label, hist, *, top_k, alpha):
    """Forward pass of TimeLagLoss.  Returns (loss, lags, weights)."""
    H, L = hist.shape[1], pred.shape[1]
    lags, weights = _select_lags(label, top_k, H + L)
    # hist cancels algebraically inside the loss (the same hist is concatenated
    # into both pred_full and label_full); only its length is needed below.
    loss = _time_lag_loss_call(
        pred, label, jnp.asarray(weights), lags=lags, hist_len=H, alpha=float(alpha)
    )
    return loss, list(lags), [float(w) for w in weights]


# ----------------------------------------------------------------------------
# Pure-numpy reference (uses the concat formulation, same selected lags/weights)
# ----------------------------------------------------------------------------
def _ref_loss(pred, label, hist, lags, weights, alpha):
    pred = np.asarray(pred, np.float32)
    label = np.asarray(label, np.float32)
    hist = np.asarray(hist, np.float32)
    pf = np.concatenate([hist, pred], axis=1)
    lf = np.concatenate([hist, label], axis=1)

    def diff(x, p):
        return x if p == 0 else x[:, p:] - x[:, :-p]

    lag_loss = sum(
        w * np.mean(np.abs(diff(pf, p) - diff(lf, p))) for p, w in zip(lags, weights)
    )
    mean_loss = np.mean(
        np.abs(pred.mean(1, keepdims=True) - label.mean(1, keepdims=True))
    )
    return lag_loss + alpha * mean_loss


# ----------------------------------------------------------------------------
if __name__ == "__main__":
    B, L, H, C = 2, 8, 8, 4   # batch, pred/label length, hist length, channels
    top_k = 3
    alpha = 0.5

    key = jax.random.PRNGKey(0)
    k1, k2, k3 = jax.random.split(key, 3)
    pred = jax.random.normal(k1, (B, L, C), dtype=jnp.float32)
    label = jax.random.normal(k2, (B, L, C), dtype=jnp.float32)
    hist = jax.random.normal(k3, (B, H, C), dtype=jnp.float32)

    loss, lags, weights = time_lag_loss(pred, label, hist, top_k=top_k, alpha=alpha)
    loss = jax.block_until_ready(loss)

    ref = _ref_loss(pred, label, hist, lags, weights, alpha)
    np.testing.assert_allclose(float(loss), float(ref), rtol=1e-4, atol=1e-5)

    print("KERNEL_OK")
</pallas_src>

<mosaic_0001>
module attributes {stable_mosaic.version = 11 : i64} {
  func.func @kernel(%arg0: i32, %arg1: memref<4xf32, #tpu.memory_space<smem>>, %arg2: memref<32x4xf32, #tpu.memory_space<vmem>>, %arg3: memref<2x32xf32, #tpu.memory_space<vmem>>, %arg4: memref<2x32xf32, #tpu.memory_space<vmem>>, %arg5: memref<1x1x1xf32, #tpu.memory_space<vmem>>, %arg6: memref<2x32xf32, #tpu.memory_space<vmem>>) attributes {dimension_semantics = [#tpu.dimension_semantics<parallel>], iteration_bounds = array<i64: 1>, scalar_prefetch = 0 : i64, scratch_operands = 1 : i64, tpu.core_type = #tpu.core_type<tc>, window_params = [{transform_indices = @transform_0, window_bounds = array<i64: 4>}, {pipeline_mode = #tpu.pipeline_mode<synchronous>, transform_indices = @transform_1, window_bounds = array<i64: 32, 4>}, {transform_indices = @transform_2, window_bounds = array<i64: 2, 32>}, {transform_indices = @transform_3, window_bounds = array<i64: 2, 32>}, {transform_indices = @transform_4, window_bounds = array<i64: 1, 1, 1>}]} {
    %c0 = arith.constant 0 : index
    %c0_0 = arith.constant 0 : index
    %0 = vector.load %arg3[%c0, %c0_0] : memref<2x32xf32, #tpu.memory_space<vmem>>, vector<2x32xf32>
    %c0_1 = arith.constant 0 : index
    %c0_2 = arith.constant 0 : index
    %1 = vector.load %arg4[%c0_1, %c0_2] : memref<2x32xf32, #tpu.memory_space<vmem>>, vector<2x32xf32>
    %2 = arith.subf %0, %1 : vector<2x32xf32>
    %cst = arith.constant 0.000000e+00 : f32
    %3 = vector.broadcast %cst : f32 to vector<2x32xf32>
    %c0_3 = arith.constant 0 : index
    %c0_4 = arith.constant 0 : index
    %4 = vector.load %arg6[%c0_3, %c0_4] : memref<2x32xf32, #tpu.memory_space<vmem>>, vector<2x32xf32>
    tpu.vector_store %arg6[%c0_3, %c0_4], %3 {strides = array<i32>} : memref<2x32xf32, #tpu.memory_space<vmem>>, vector<2x32xf32>,
    %c0_5 = arith.constant 0 : index
    %5 = memref.load %arg1[%c0_5] : memref<4xf32, #tpu.memory_space<smem>>
    %c0_6 = arith.constant 0 : index
    %c0_7 = arith.constant 0 : index
    %6 = vector.load %arg6[%c0_6, %c0_7] : memref<2x32xf32, #tpu.memory_space<vmem>>, vector<2x16xf32>
    %7 = vector.extract_strided_slice %2 {offsets = [0, 0], sizes = [2, 16], strides = [1, 1]} : vector<2x32xf32> to vector<2x16xf32>
    %8 = math.absf %7 : vector<2x16xf32>
    %9 = vector.broadcast %5 : f32 to vector<2x16xf32>
    %10 = arith.mulf %8, %9 : vector<2x16xf32>
    %11 = arith.addf %6, %10 : vector<2x16xf32>
    %c0_8 = arith.constant 0 : index
    %c0_9 = arith.constant 0 : index
    %12 = vector.load %arg6[%c0_8, %c0_9] : memref<2x32xf32, #tpu.memory_space<vmem>>, vector<2x16xf32>
    tpu.vector_store %arg6[%c0_8, %c0_9], %11 {strides = array<i32>} : memref<2x32xf32, #tpu.memory_space<vmem>>, vector<2x16xf32>,
    %c0_10 = arith.constant 0 : index
    %c0_11 = arith.constant 0 : index
    %13 = vector.load %arg6[%c0_10, %c0_11] : memref<2x32xf32, #tpu.memory_space<vmem>>, vector<2x16xf32>
    %14 = vector.extract_strided_slice %2 {offsets = [0, 16], sizes = [2, 16], strides = [1, 1]} : vector<2x32xf32> to vector<2x16xf32>
    %15 = vector.extract_strided_slice %2 {offsets = [0, 0], sizes = [2, 16], strides = [1, 1]} : vector<2x32xf32> to vector<2x16xf32>
    %16 = arith.subf %14, %15 : vector<2x16xf32>
    %17 = math.absf %16 : vector<2x16xf32>
    %18 = vector.broadcast %5 : f32 to vector<2x16xf32>
    %19 = arith.mulf %17, %18 : vector<2x16xf32>
    %20 = arith.addf %13, %19 : vector<2x16xf32>
    %c0_12 = arith.constant 0 : index
    %c0_13 = arith.constant 0 : index
    %21 = vector.load %arg6[%c0_12, %c0_13] : memref<2x32xf32, #tpu.memory_space<vmem>>, vector<2x16xf32>
    tpu.vector_store %arg6[%c0_12, %c0_13], %20 {strides = array<i32>} : memref<2x32xf32, #tpu.memory_space<vmem>>, vector<2x16xf32>,
    %c1 = arith.constant 1 : index
    %22 = memref.load %arg1[%c1] : memref<4xf32, #tpu.memory_space<smem>>
    %c0_14 = arith.constant 0 : index
    %c0_15 = arith.constant 0 : index
    %23 = vector.load %arg6[%c0_14, %c0_15] : memref<2x32xf32, #tpu.memory_space<vmem>>, vector<2x8xf32>
    %24 = vector.extract_strided_slice %2 {offsets = [0, 0], sizes = [2, 8], strides = [1, 1]} : vector<2x32xf32> to vector<2x8xf32>
    %25 = math.absf %24 : vector<2x8xf32>
    %26 = vector.broadcast %22 : f32 to vector<2x8xf32>
    %27 = arith.mulf %25, %26 : vector<2x8xf32>
    %28 = arith.addf %23, %27 : vector<2x8xf32>
    %c0_16 = arith.constant 0 : index
    %c0_17 = arith.constant 0 : index
    %29 = vector.load %arg6[%c0_16, %c0_17] : memref<2x32xf32, #tpu.memory_space<vmem>>, vector<2x8xf32>
    tpu.vector_store %arg6[%c0_16, %c0_17], %28 {strides = array<i32>} : memref<2x32xf32, #tpu.memory_space<vmem>>, vector<2x8xf32>,
    %c0_18 = arith.constant 0 : index
    %c0_19 = arith.constant 0 : index
    %30 = vector.load %arg6[%c0_18, %c0_19] : memref<2x32xf32, #tpu.memory_space<vmem>>, vector<2x24xf32>
    %31 = vector.extract_strided_slice %2 {offsets = [0, 8], sizes = [2, 24], strides = [1, 1]} : vector<2x32xf32> to vector<2x24xf32>
    %32 = vector.extract_strided_slice %2 {offsets = [0, 0], sizes = [2, 24], strides = [1, 1]} : vector<2x32xf32> to vector<2x24xf32>
    %33 = arith.subf %31, %32 : vector<2x24xf32>
    %34 = math.absf %33 : vector<2x24xf32>
    %35 = vector.broadcast %22 : f32 to vector<2x24xf32>
    %36 = arith.mulf %34, %35 : vector<2x24xf32>
    %37 = arith.addf %30, %36 : vector<2x24xf32>
    %c0_20 = arith.constant 0 : index
    %c0_21 = arith.constant 0 : index
    %38 = vector.load %arg6[%c0_20, %c0_21] : memref<2x32xf32, #tpu.memory_space<vmem>>, vector<2x24xf32>
    tpu.vector_store %arg6[%c0_20, %c0_21], %37 {strides = array<i32>} : memref<2x32xf32, #tpu.memory_space<vmem>>, vector<2x24xf32>,
    %c2 = arith.constant 2 : index
    %39 = memref.load %arg1[%c2] : memref<4xf32, #tpu.memory_space<smem>>
    %c0_22 = arith.constant 0 : index
    %c0_23 = arith.constant 0 : index
    %40 = vector.load %arg6[%c0_22, %c0_23] : memref<2x32xf32, #tpu.memory_space<vmem>>, vector<2x32xf32>
    %41 = math.absf %2 : vector<2x32xf32>
    %42 = vector.broadcast %39 : f32 to vector<2x32xf32>
    %43 = arith.mulf %41, %42 : vector<2x32xf32>
    %44 = arith.addf %40, %43 : vector<2x32xf32>
    %c0_24 = arith.constant 0 : index
    %c0_25 = arith.constant 0 : index
    %45 = vector.load %arg6[%c0_24, %c0_25] : memref<2x32xf32, #tpu.memory_space<vmem>>, vector<2x32xf32>
    tpu.vector_store %arg6[%c0_24, %c0_25], %44 {strides = array<i32>} : memref<2x32xf32, #tpu.memory_space<vmem>>, vector<2x32xf32>,
    %c0_26 = arith.constant 0 : index
    %c0_27 = arith.constant 0 : index
    %46 = vector.load %arg6[%c0_26, %c0_27] : memref<2x32xf32, #tpu.memory_space<vmem>>, vector<2x32xf32>
    %cst_28 = arith.constant dense<0.000000e+00> : vector<2xf32>
    %47 = vector.multi_reduction <add>, %46, %cst_28 [1] : vector<2x32xf32> to vector<2xf32>
    %48 = vector.shape_cast %47 : vector<2xf32> to vector<2x1xf32>
    %cst_29 = arith.constant dense<0.000000e+00> : vector<1xf32>
    %49 = vector.multi_reduction <add>, %48, %cst_29 [0] : vector<2x1xf32> to vector<1xf32>
    %50 = vector.shape_cast %49 : vector<1xf32> to vector<1x1xf32>
    %c0_30 = arith.constant 0 : index
    %c0_31 = arith.constant 0 : index
    %51 = vector.load %arg2[%c0_30, %c0_31] : memref<32x4xf32, #tpu.memory_space<vmem>>, vector<32x4xf32>
    %cst_32 = arith.constant dense<0.000000e+00> : vector<2x4xf32>
    %52 = tpu.matmul %2, %51, %cst_32 {dimension_numbers = #tpu.dot_dimension_numbers<[1], [0], [0], [1], [0, 0, 1, 1], [], []>} : vector<2x32xf32>, vector<32x4xf32>, vector<2x4xf32> -> vector<2x4xf32>
    %53 = math.absf %52 : vector<2x4xf32>
    %cst_33 = arith.constant dense<0.000000e+00> : vector<2xf32>
    %54 = vector.multi_reduction <add>, %53, %cst_33 [1] : vector<2x4xf32> to vector<2xf32>
    %55 = vector.shape_cast %54 : vector<2xf32> to vector<2x1xf32>
    %cst_34 = arith.constant dense<0.000000e+00> : vector<1xf32>
    %56 = vector.multi_reduction <add>, %55, %cst_34 [0] : vector<2x1xf32> to vector<1xf32>
    %57 = vector.shape_cast %56 : vector<1xf32> to vector<1x1xf32>
    %c3 = arith.constant 3 : index
    %58 = memref.load %arg1[%c3] : memref<4xf32, #tpu.memory_space<smem>>
    %59 = vector.broadcast %58 : f32 to vector<1x1xf32>
    %60 = arith.mulf %57, %59 : vector<1x1xf32>
    %61 = arith.addf %50, %60 : vector<1x1xf32>
    %c0_35 = arith.constant 0 : index
    %c0_36 = arith.constant 0 : index
    %c0_37 = arith.constant 0 : index
    %62 = vector.load %arg5[%c0_35, %c0_36, %c0_37] : memref<1x1x1xf32, #tpu.memory_space<vmem>>, vector<1x1x1xf32>
    %63 = vector.shape_cast %62 : vector<1x1x1xf32> to vector<1x1xf32>
    %64 = vector.shape_cast %61 : vector<1x1xf32> to vector<1x1x1xf32>
    tpu.vector_store %arg5[%c0_35, %c0_36, %c0_37], %64 {strides = array<i32>} : memref<1x1x1xf32, #tpu.memory_space<vmem>>, vector<1x1x1xf32>,
    return
  }
  func.func @transform_0(%arg0: i32) -> i32 {
    %c0_i32 = arith.constant 0 : i32
    %c0_i32_0 = arith.constant 0 : i32
    return %c0_i32 : i32
  }
  func.func @transform_1(%arg0: i32) -> (i32, i32) {
    %c0_i32 = arith.constant 0 : i32
    %c0_i32_0 = arith.constant 0 : i32
    %c0_i32_1 = arith.constant 0 : i32
    return %c0_i32, %c0_i32_0 : i32, i32
  }
  func.func @transform_2(%arg0: i32) -> (i32, i32) {
    %c0_i32 = arith.constant 0 : i32
    %c0_i32_0 = arith.constant 0 : i32
    return %arg0, %c0_i32 : i32, i32
  }
  func.func @transform_3(%arg0: i32) -> (i32, i32) {
    %c0_i32 = arith.constant 0 : i32
    %c0_i32_0 = arith.constant 0 : i32
    return %arg0, %c0_i32 : i32, i32
  }
  func.func @transform_4(%arg0: i32) -> (i32, i32, i32) {
    %c0_i32 = arith.constant 0 : i32
    %c0_i32_0 = arith.constant 0 : i32
    %c0_i32_1 = arith.constant 0 : i32
    return %arg0, %c0_i32, %c0_i32_0 : i32, i32, i32
  }
}

</mosaic_0001>

<bundles_post_ra>
// kernel: _time_lag_loss_call.1
= control target key start
LH: loop header
LB: loop body
LE: loop exit
PB: predicated region body
PF: predicated region fallthrough
CT: control target
= control target key end

     0   :  { %9 = vsyncpa [#allocation5], 0  ;;  %s352_s0 = inlined_call_operand.vmem [shape: f32[4], index: 0, kind: input, shape index: {}]   ;;  %s353_s1 = inlined_call_operand.vmem [shape: f32[32,4], index: 1, kind: input, shape index: {}]   ;;  %s354_s2 = inlined_call_operand.vmem [shape: f32[2,32], index: 2, kind: input, shape index: {}]   ;;  %s355_s3 = inlined_call_operand.vmem [shape: f32[2,32], index: 3, kind: input, shape index: {}]   ;;  %s356_s4 = inlined_call_operand.hbm [shape: f32[1,1,1], index: 4, kind: output, shape index: {}]  }
   0x1   :  { %10 = vsyncpa [#allocation4], 0  ;;  %s17_s17 = sshll.u32 %s352_s0, 4  ;;  %s18_s17 = int_to_ptr.vmem [resolvable:$true] %s17_s17 }
   0x2   :  { %s242_s18 = scalar_lea.vmem %s18_s17, 16  ;;  %p247_p1 = scmp.lt.s32.totalorder %s18_s17, %s18_s17 }
   0x3   :  { %p243_p0 = scmp.ne.s32.totalorder %s18_s17, %s242_s18  ;;  %p248_p2 = scmp.lt.s32.totalorder %s242_s18, %s242_s18 }
   0x5   :  { %p249_p3 = por %p248_p2, %p247_p1 }
   0x7   :  { %p250_p4 = pnand %p249_p3, %p243_p0 }
   0x9   :  { %253 = shalt.err (!%p250_p4)
}
   0xa   :  { %s280_s19 = smov [#allocation3]  }
   0xb   :  { %20 = dma.vmem_to_smem %s18_s17, 16, %s280_s19, [#allocation5]  }
   0xc   :  { %276 = dma.done.wait [#allocation5], 16  }
   0xd   :  { %277 = vsyncadd [#allocation5], 4294967280 }
   0xe   :  { %30 = sfence }
   0xf   :  { %v31_v0 = vld [vmem:[%s354_s2] sm:$0x3]  ;;  %v98_v4 = vld [vmem:[%s353_s1 + $0x8] sm:$0xff]  ;;  %v99_v5 = vld [vmem:[%s353_s1 + $0x10] sm:$0xff]  ;;  %vm34_vm0 = vcmask 254976   ;;  %v281_v6 = vmov 0.0|0.0  }
  0x10   :  { %v32_v1 = vld [vmem:[%s355_s3] sm:$0x3]  ;;  %227 = vmatprep.subr.bf16.mxu0 %v281_v6  ;;  %v100_v8 = vld [vmem:[%s353_s1 + $0x18] sm:$0xff]  ;;  %v282_v9 = vmov 0.0   ;;  %s36_s3 = sld [smem:[#allocation3]]  ;;  %s283_s30 = smov 16  }
  0x11   :  { %v33_v2 = vsub.f32 %v31_v0, %v32_v1  ;;  %v97_v3 = vld [vmem:[%s353_s1] sm:$0xff]  ;;  %35 = vst.msk [vmem:[#allocation2] sm:$0x3] %vm34_vm0, %v282_v9  ;;  %vm284_vm1 = vmmov 0   ;;  %v231_v10 = vpack.c.bf16 %v100_v8, %v99_v5  ;;  %s285_s5 = smov 8   ;;  %vm101_vm2 = vcmask 261120  }
  0x12   :  { %v228_v7 = vpack.c.bf16 %v98_v4, %v97_v3  ;;  %224 = vmatprep.mubr.msk.f32.mxu0 %vm284_vm1, %v282_v9  ;;  %vm42_vm3 = vcmask 123904   ;;  %s207_s1 = sld [smem:[#allocation3 + $0x1]]  ;;  %s286_s6 = smov 112   ;;  %vm175_vm4 = vcmask 25600   ;;  %vm63_vm5 = vcmask 58368  }
  0x13   :  { %46 = vrot.lane.b32.xlu0 %v33_v2, %s283_s30  ;;  %v38_v11 = vand.u32 2147483647, %v33_v2  ;;  %s287_s7 = smov 120   ;;  %s208_s8 = sld [smem:[#allocation3 + $0x2]]  ;;  %vm77_vm6 = vcmask 189440   ;;  %vm89_vm7 = vcmask 1041408  }
  0x14   :  { %229 = vmatpush3.bf16.msra.mxu0 %v228_v7  ;;  %s210_s9 = sld [smem:[#allocation3 + $0x3]]  ;;  %s288_s10 = smov [#allocation6]   ;;  %vm190_vm8 = vcmask 0  }
  0x15   :  { %230 = vmatprep.subr.bf16.mxu0 %v281_v6  ;;  %s198_s11 = sshll.u32 %s288_s10, 4  ;;  %s199_s11 = int_to_ptr.vmem [resolvable:$true] %s198_s11 }
  0x16   :  { %v39_v12 = vstv %s36_s3  ;;  %s254_s12 = scalar_lea.vmem %s199_s11, 16  ;;  %s258_s13 = scalar_lea.vmem %s199_s11, 32 }
  0x17   :  { %66 = vrot.lane.b32.xlu0 %v33_v2, %s285_s5  ;;  %v40_v14 = vmul.f32 %v39_v12, %v38_v11  ;;  %p255_p5 = scmp.ne.s32.totalorder %s199_s11, %s254_s12  ;;  %p259_p6 = scmp.lt.s32.totalorder %s199_s11, %s199_s11 }
  0x18   :  { %232 = vmatpush3.bf16.msra.mxu0 %v231_v10  ;;  %v37_v13 = vld [vmem:[#allocation2] sm:$0x3]  ;;  %v60_v22 = vstv %s207_s1  ;;  %p260_p7 = scmp.lt.s32.totalorder %s258_s13, %s254_s12 }
  0x19   :  { %v41_v15 = vadd.f32 %v40_v14, %v37_v13  ;;  %v61_v32 = vmul.f32 %v60_v22, %v38_v11  ;;  %v81_v38 = vstv %s208_s8 }
  0x1a   :  { %v82_v39 = vmul.f32 %v81_v38, %v38_v11  ;;  %v187_v58 = vstv %s210_s9  ;;  %p261_p8 = por %p260_p7, %p259_p6 }
  0x1b   :  { %225 = vmatmul.mubr.msk.f32.vlgmr.msra.gmra.mrb[0].mxu0 %vm101_vm2, %v33_v2  ;;  %43 = vst.msk [vmem:[#allocation2] sm:$0x3] %vm42_vm3, %v41_v15 }
  0x1c   :  { %p262_p9 = pnand %p261_p8, %p255_p5 }
  0x22   :  { %v44_v29 = vld [vmem:[#allocation2] sm:$0x3] }
  0x85   :  { %v47_v16 = vpop.permute.xlu0 %46 }
  0x86   :  { %v49_v17 = vsub.f32 %v33_v2, %v47_v16 }
  0x88   :  { %v50_v18 = vand.u32 2147483647, %v49_v17 }
  0x89   :  { %v67_v19 = vpop.permute.xlu0 %66 }
  0x8a   :  { %v51_v20 = vmul.f32 %v50_v18, %v39_v12  ;;  %v69_v21 = vsub.f32 %v33_v2, %v67_v19 }
  0x8c   :  { %53 = vrot.lane.b32.xlu1 %v51_v20, %s286_s6  ;;  %v70_v23 = vand.u32 2147483647, %v69_v21 }
  0x8e   :  { %v71_v24 = vmul.f32 %v70_v23, %v60_v22 }
  0x90   :  { %73 = vrot.lane.b32.xlu1 %v71_v24, %s287_s7 }
  0xee   :  { %v170_v25 = vpop.f32.mrb[0].mxu0 }
  0xef   :  { %v174_v26 = vand.u32 2147483647, %v170_v25  ;;  %v226_v27 = vpop.f32.mrb[1].mxu0 }
  0xf1   :  { %v176_v28 = vsel %vm175_vm4, %v174_v26, 0.0 }
  0xf2   :  { %177 = vadd.xlane.f32.xlu0 %v176_v28 }
  0xfe   :  { %v54_v30 = vpop.permute.xlu1 %53 }
  0xff   :  { %v56_v31 = vadd.f32 %v54_v30, %v44_v29 }
 0x101   :  { %57 = vst.msk [vmem:[#allocation2] sm:$0x3] %vm42_vm3, %v56_v31 }
 0x102   :  { %v74_v35 = vpop.permute.xlu1 %73 }
 0x108   :  { %v59_v33 = vld [vmem:[#allocation2] sm:$0x3] }
 0x109   :  { %v62_v34 = vadd.f32 %v61_v32, %v59_v33 }
 0x10b   :  { %64 = vst.msk [vmem:[#allocation2] sm:$0x3] %vm63_vm5, %v62_v34 }
 0x112   :  { %v65_v36 = vld [vmem:[#allocation2] sm:$0x3] }
 0x113   :  { %v76_v37 = vadd.f32 %v74_v35, %v65_v36 }
 0x115   :  { %78 = vst.msk [vmem:[#allocation2] sm:$0x3] %vm77_vm6, %v76_v37 }
 0x11c   :  { %v80_v40 = vld [vmem:[#allocation2] sm:$0x3] }
 0x11d   :  { %v83_v41 = vadd.f32 %v82_v39, %v80_v40 }
 0x11f   :  { %84 = vst.msk [vmem:[#allocation2] sm:$0x3] %vm34_vm0, %v83_v41 }
 0x126   :  { %v85_v42 = vld [vmem:[#allocation2] sm:$0x3] }
 0x127   :  { %v86_v43 = vsel %vm34_vm0, %v85_v42, 0.0 }
 0x128   :  { %87 = vadd.xlane.f32.xlu1 %v86_v43 }
 0x17f   :  { %v178_v44 = vpop.xlane.xlu0 %177 }
 0x180   :  { %v179_v45 = vsel %vm89_vm7, %v178_v44, 0.0 }
 0x181   :  { %v180_v46 = vrot.slane %v179_v45, 4 }
 0x183   :  { %v181_v47 = vadd.f32 %v180_v46, %v179_v45 }
 0x185   :  { %v182_v48 = vrot.slane %v181_v47, 2 }
 0x187   :  { %v183_v49 = vadd.f32 %v182_v48, %v181_v47 }
 0x189   :  { %v184_v53 = vrot.slane %v183_v49, 1 }
 0x18b   :  { %v185_v56 = vadd.f32 %v184_v53, %v183_v49 }
 0x18d   :  { %v188_v61 = vmul.f32 %v187_v58, %v185_v56 }
 0x1b5   :  { %v88_v50 = vpop.xlane.xlu1 %87 }
 0x1b6   :  { %v90_v51 = vsel %vm89_vm7, %v88_v50, 0.0 }
 0x1b7   :  { %v91_v52 = vrot.slane %v90_v51, 4 }
 0x1b9   :  { %v92_v54 = vadd.f32 %v91_v52, %v90_v51 }
 0x1bb   :  { %v93_v55 = vrot.slane %v92_v54, 2 }
 0x1bd   :  { %v94_v57 = vadd.f32 %v93_v55, %v92_v54 }
 0x1bf   :  { %v95_v59 = vrot.slane %v94_v57, 1 }
 0x1c1   :  { %v96_v60 = vadd.f32 %v95_v59, %v94_v57 }
 0x1c3   :  { %v189_v62 = vadd.f32 %v188_v61, %v96_v60 }
 0x1c5   :  { %191 = vst.msk [vmem:[#allocation6] sm:$0x1] %vm190_vm8, %v189_v62 }
 0x1c6   :  { %265 = shalt.err (!%p262_p9)
}
 0x1c7   :  { %s266_s16 = scalar_lea.hbm %s356_s4, 16 }
 0x1c8   :  { %p267_p10 = scmp.ne.s32.totalorder %s356_s4, %s266_s16  ;;  %p270_p11 = scmp.lt.u32.totalorder %s266_s16, %s356_s4 }
 0x1ca   :  { %p272_p12 = pnand %p270_p11, %p267_p10 }
 0x1cc   :  { %275 = shalt.err (!%p272_p12)
}
 0x1cd   :  { %201 = dma.vmem_to_hbm [thread:$0]  %s199_s11, 16, %s356_s4, [#allocation4]  }
 0x1ce   :  { %278 = dma.done.wait [#allocation4], 16  }
 0x1cf   :  { %279 = vsyncadd [#allocation4], 4294967280 }
 0x1d0   :  { %205 = vsyncpa [#allocation4], 1 }
 0x1d1   :  { %206 = vsyncpa [#allocation5], 1 }

</bundles_post_ra>
